<compile_context>
chip_gen: v6e
topology: v6e:2x2x1
jax: 0.10.0
libtpu: 0.0.40
codegen_flags: <defaults>
</compile_context>

<pallas_src>
import math

import jax
import jax.numpy as jnp
from jax.experimental import pallas as pl
from jax.experimental.pallas import tpu as pltpu

_LANE = 128
# 2048 rows x 128 lanes: per grid step 2 f32 in + 4 f32 out + 3 bool out
# ~= 6.8 MiB, x2 for double buffering ~= 13.6 MiB.  Fits default scoped VMEM on
# v6e/v7x (32 MiB); on v5e (16 MiB default) we raise vmem_limit_bytes below.
_MAX_TILE_ROWS = 2048
_VMEM_LIMIT_BYTES = 40 << 20  # well under physical VMEM on v5e/v6e (128 MiB) and v7x (64 MiB)


def _cdiv(a, b):
    return -(-a // b)


def _round_up(x, m):
    return ((x + m - 1) // m) * m


def _elementwise_kernel(x1_ref, x2_ref,
                        add_ref, sub_ref, mul_ref, div_ref,
                        gt_ref, lt_ref, eq_ref):
    x1 = x1_ref[...]
    x2 = x2_ref[...]
    add_ref[...] = x1 + x2
    sub_ref[...] = x1 - x2
    mul_ref[...] = x1 * x2
    div_ref[...] = x1 / x2
    # comparison outputs are bool refs; Mosaic stores them packed
    gt_ref[...] = x1 > x2
    lt_ref[...] = x1 < x2
    eq_ref[...] = x1 == x2


def _pick_tile_rows(rows):
    """Row-tile size: lane-dense, 32-row aligned, and (for non-tiny slabs) an
    even number of >=2 grid steps so v7x's two TensorCores both get work."""
    if rows <= 64:
        return rows  # tiny slab: single full-extent block (always legal)
    steps = max(2, _cdiv(rows, _MAX_TILE_ROWS))
    if steps % 2:
        steps += 1  # even step count -> balanced across the two TCs
    return min(_MAX_TILE_ROWS, _round_up(_cdiv(rows, steps), 32))


def _run_pallas(x1s, x2s):
    rows, lane = x1s.shape
    dtype = x1s.dtype
    n = rows * lane

    tr = _pick_tile_rows(rows)
    grid = (_cdiv(rows, tr),)
    spec = pl.BlockSpec((tr, lane), lambda i: (i, 0))

    out_shapes = (
        jax.ShapeDtypeStruct((rows, lane), dtype),      # add
        jax.ShapeDtypeStruct((rows, lane), dtype),      # sub
        jax.ShapeDtypeStruct((rows, lane), dtype),      # mul
        jax.ShapeDtypeStruct((rows, lane), dtype),      # div
        jax.ShapeDtypeStruct((rows, lane), jnp.bool_),  # gt
        jax.ShapeDtypeStruct((rows, lane), jnp.bool_),  # lt
        jax.ShapeDtypeStruct((rows, lane), jnp.bool_),  # eq
    )

    # 2 f32 in + 4 f32 out + 3 bool out ~= 27 bytes / element; ~7 "flops" / element.
    cost = pl.CostEstimate(flops=7 * n, transcendentals=0, bytes_accessed=27 * n)

    return pl.pallas_call(
        _elementwise_kernel,
        out_shape=out_shapes,
        grid=grid,
        in_specs=[spec, spec],
        out_specs=tuple(spec for _ in range(7)),
        compiler_params=pltpu.CompilerParams(
            dimension_semantics=("parallel",),
            vmem_limit_bytes=_VMEM_LIMIT_BYTES,
        ),
        cost_estimate=cost,
    )(x1s, x2s)


@jax.jit
def pt_module_forward(x1, x2):
    assert x1.shape == x2.shape and x1.dtype == x2.dtype
    orig_shape = x1.shape
    dtype = x1.dtype
    n = math.prod(orig_shape)

    if n == 0:
        z = jnp.zeros(orig_shape, dtype)
        zb = jnp.zeros(orig_shape, jnp.bool_)
        return (z, z, z, z, zb, zb, zb)

    flat1 = x1.reshape(-1)
    flat2 = x2.reshape(-1)

    rows = _cdiv(n, _LANE)
    pad = rows * _LANE - n
    if pad:
        # Single pad per input instead of a separate tail path + concatenates.
        # x2 padded with 1.0 so the padded region of the division stays finite.
        flat1 = jnp.pad(flat1, (0, pad))
        flat2 = jnp.pad(flat2, (0, pad), constant_values=1.0)

    x1s = flat1.reshape(rows, _LANE)
    x2s = flat2.reshape(rows, _LANE)

    outs = _run_pallas(x1s, x2s)

    results = []
    for o in outs:
        flat = o.reshape(-1)
        if pad:
            flat = flat[:n]
        results.append(flat.reshape(orig_shape))
    return tuple(results)


if __name__ == "__main__":
    key = jax.random.PRNGKey(0)
    k1, k2 = jax.random.split(key)
    shape = (2, 4, 16, 16)
    x1 = jax.random.normal(k1, shape, dtype=jnp.float32)
    # keep x2 away from zero so the division check is well-behaved
    x2 = jax.random.normal(k2, shape, dtype=jnp.float32) + 2.0

    results = jax.block_until_ready(pt_module_forward(x1, x2))

    # quick correctness check against plain JAX
    refs = (x1 + x2, x1 - x2, x1 * x2, x1 / x2, x1 > x2, x1 < x2, x1 == x2)
    ok = True
    for got, ref in zip(results, refs):
        assert got.shape == ref.shape, (got.shape, ref.shape)
        assert got.dtype == ref.dtype, (got.dtype, ref.dtype)
        if got.dtype == jnp.bool_:
            ok &= bool(jnp.all(got == ref))
        else:
            ok &= bool(jnp.allclose(got, ref, rtol=1e-6, atol=1e-6))
    assert ok, "mismatch vs reference"

    print("KERNEL_OK")
</pallas_src>

<mosaic_0001>
module attributes {stable_mosaic.version = 11 : i64} {
  func.func @_elementwise_kernel(%arg0: i32, %arg1: memref<16x128xf32, #tpu.memory_space<vmem>>, %arg2: memref<16x128xf32, #tpu.memory_space<vmem>>, %arg3: memref<16x128xf32, #tpu.memory_space<vmem>>, %arg4: memref<16x128xf32, #tpu.memory_space<vmem>>, %arg5: memref<16x128xf32, #tpu.memory_space<vmem>>, %arg6: memref<16x128xf32, #tpu.memory_space<vmem>>, %arg7: memref<16x128xi32, #tpu.memory_space<vmem>>, %arg8: memref<16x128xi32, #tpu.memory_space<vmem>>, %arg9: memref<16x128xi32, #tpu.memory_space<vmem>>) attributes {dimension_semantics = [#tpu.dimension_semantics<parallel>], iteration_bounds = array<i64: 1>, scalar_prefetch = 0 : i64, scratch_operands = 0 : i64, tpu.core_type = #tpu.core_type<tc>, window_params = [{transform_indices = @transform_0, window_bounds = array<i64: 16, 128>}, {transform_indices = @transform_1, window_bounds = array<i64: 16, 128>}, {transform_indices = @transform_2, window_bounds = array<i64: 16, 128>}, {transform_indices = @transform_3, window_bounds = array<i64: 16, 128>}, {transform_indices = @transform_4, window_bounds = array<i64: 16, 128>}, {transform_indices = @transform_5, window_bounds = array<i64: 16, 128>}, {transform_indices = @transform_6, window_bounds = array<i64: 16, 128>}, {transform_indices = @transform_7, window_bounds = array<i64: 16, 128>}, {transform_indices = @transform_8, window_bounds = array<i64: 16, 128>}]} {
    %c0 = arith.constant 0 : index
    %c0_0 = arith.constant 0 : index
    %0 = vector.load %arg1[%c0, %c0_0] : memref<16x128xf32, #tpu.memory_space<vmem>>, vector<16x128xf32>
    %c0_1 = arith.constant 0 : index
    %c0_2 = arith.constant 0 : index
    %1 = vector.load %arg2[%c0_1, %c0_2] : memref<16x128xf32, #tpu.memory_space<vmem>>, vector<16x128xf32>
    %2 = arith.addf %0, %1 : vector<16x128xf32>
    %c0_3 = arith.constant 0 : index
    %c0_4 = arith.constant 0 : index
    %3 = vector.load %arg3[%c0_3, %c0_4] : memref<16x128xf32, #tpu.memory_space<vmem>>, vector<16x128xf32>
    tpu.vector_store %arg3[%c0_3, %c0_4], %2 {strides = array<i32>} : memref<16x128xf32, #tpu.memory_space<vmem>>, vector<16x128xf32>,
    %4 = arith.subf %0, %1 : vector<16x128xf32>
    %c0_5 = arith.constant 0 : index
    %c0_6 = arith.constant 0 : index
    %5 = vector.load %arg4[%c0_5, %c0_6] : memref<16x128xf32, #tpu.memory_space<vmem>>, vector<16x128xf32>
    tpu.vector_store %arg4[%c0_5, %c0_6], %4 {strides = array<i32>} : memref<16x128xf32, #tpu.memory_space<vmem>>, vector<16x128xf32>,
    %6 = arith.mulf %0, %1 : vector<16x128xf32>
    %c0_7 = arith.constant 0 : index
    %c0_8 = arith.constant 0 : index
    %7 = vector.load %arg5[%c0_7, %c0_8] : memref<16x128xf32, #tpu.memory_space<vmem>>, vector<16x128xf32>
    tpu.vector_store %arg5[%c0_7, %c0_8], %6 {strides = array<i32>} : memref<16x128xf32, #tpu.memory_space<vmem>>, vector<16x128xf32>,
    %8 = arith.divf %0, %1 : vector<16x128xf32>
    %c0_9 = arith.constant 0 : index
    %c0_10 = arith.constant 0 : index
    %9 = vector.load %arg6[%c0_9, %c0_10] : memref<16x128xf32, #tpu.memory_space<vmem>>, vector<16x128xf32>
    tpu.vector_store %arg6[%c0_9, %c0_10], %8 {strides = array<i32>} : memref<16x128xf32, #tpu.memory_space<vmem>>, vector<16x128xf32>,
    %10 = arith.cmpf ogt, %0, %1 : vector<16x128xf32>
    %c0_11 = arith.constant 0 : index
    %c0_12 = arith.constant 0 : index
    %11 = vector.load %arg7[%c0_11, %c0_12] : memref<16x128xi32, #tpu.memory_space<vmem>>, vector<16x128xi32>
    %12 = arith.extui %10 : vector<16x128xi1> to vector<16x128xi32>
    %cst = arith.constant dense<0> : vector<16x128xi32>
    %13 = arith.cmpi ne, %11, %cst : vector<16x128xi32>
    tpu.vector_store %arg7[%c0_11, %c0_12], %12 {strides = array<i32>} : memref<16x128xi32, #tpu.memory_space<vmem>>, vector<16x128xi32>,
    %14 = arith.cmpf olt, %0, %1 : vector<16x128xf32>
    %c0_13 = arith.constant 0 : index
    %c0_14 = arith.constant 0 : index
    %15 = vector.load %arg8[%c0_13, %c0_14] : memref<16x128xi32, #tpu.memory_space<vmem>>, vector<16x128xi32>
    %16 = arith.extui %14 : vector<16x128xi1> to vector<16x128xi32>
    %cst_15 = arith.constant dense<0> : vector<16x128xi32>
    %17 = arith.cmpi ne, %15, %cst_15 : vector<16x128xi32>
    tpu.vector_store %arg8[%c0_13, %c0_14], %16 {strides = array<i32>} : memref<16x128xi32, #tpu.memory_space<vmem>>, vector<16x128xi32>,
    %18 = arith.cmpf oeq, %0, %1 : vector<16x128xf32>
    %c0_16 = arith.constant 0 : index
    %c0_17 = arith.constant 0 : index
    %19 = vector.load %arg9[%c0_16, %c0_17] : memref<16x128xi32, #tpu.memory_space<vmem>>, vector<16x128xi32>
    %20 = arith.extui %18 : vector<16x128xi1> to vector<16x128xi32>
    %cst_18 = arith.constant dense<0> : vector<16x128xi32>
    %21 = arith.cmpi ne, %19, %cst_18 : vector<16x128xi32>
    tpu.vector_store %arg9[%c0_16, %c0_17], %20 {strides = array<i32>} : memref<16x128xi32, #tpu.memory_space<vmem>>, vector<16x128xi32>,
    return
  }
  func.func @transform_0(%arg0: i32) -> (i32, i32) {
    %c0_i32 = arith.constant 0 : i32
    %c0_i32_0 = arith.constant 0 : i32
    return %arg0, %c0_i32 : i32, i32
  }
  func.func @transform_1(%arg0: i32) -> (i32, i32) {
    %c0_i32 = arith.constant 0 : i32
    %c0_i32_0 = arith.constant 0 : i32
    return %arg0, %c0_i32 : i32, i32
  }
  func.func @transform_2(%arg0: i32) -> (i32, i32) {
    %c0_i32 = arith.constant 0 : i32
    %c0_i32_0 = arith.constant 0 : i32
    return %arg0, %c0_i32 : i32, i32
  }
  func.func @transform_3(%arg0: i32) -> (i32, i32) {
    %c0_i32 = arith.constant 0 : i32
    %c0_i32_0 = arith.constant 0 : i32
    return %arg0, %c0_i32 : i32, i32
  }
  func.func @transform_4(%arg0: i32) -> (i32, i32) {
    %c0_i32 = arith.constant 0 : i32
    %c0_i32_0 = arith.constant 0 : i32
    return %arg0, %c0_i32 : i32, i32
  }
  func.func @transform_5(%arg0: i32) -> (i32, i32) {
    %c0_i32 = arith.constant 0 : i32
    %c0_i32_0 = arith.constant 0 : i32
    return %arg0, %c0_i32 : i32, i32
  }
  func.func @transform_6(%arg0: i32) -> (i32, i32) {
    %c0_i32 = arith.constant 0 : i32
    %c0_i32_0 = arith.constant 0 : i32
    return %arg0, %c0_i32 : i32, i32
  }
  func.func @transform_7(%arg0: i32) -> (i32, i32) {
    %c0_i32 = arith.constant 0 : i32
    %c0_i32_0 = arith.constant 0 : i32
    return %arg0, %c0_i32 : i32, i32
  }
  func.func @transform_8(%arg0: i32) -> (i32, i32) {
    %c0_i32 = arith.constant 0 : i32
    %c0_i32_0 = arith.constant 0 : i32
    return %arg0, %c0_i32 : i32, i32
  }
}

</mosaic_0001>

<bundles_post_ra>
// kernel: pt_module_forward.1
= control target key start
LH: loop header
LB: loop body
LE: loop exit
PB: predicated region body
PF: predicated region fallthrough
CT: control target
= control target key end

     0   :  { %v91_v10 = vmov 0   ;;  %s191_s0 = inlined_call_operand.vmem [shape: f32[16,128], index: 0, kind: input, shape index: {}]   ;;  %s192_s1 = inlined_call_operand.vmem [shape: f32[16,128], index: 1, kind: input, shape index: {}]   ;;  %s193_s2 = inlined_call_operand.vmem [shape: f32[16,128], index: 2, kind: output, shape index: {0}]   ;;  %s194_s3 = inlined_call_operand.vmem [shape: f32[16,128], index: 3, kind: output, shape index: {1}]   ;;  %s195_s4 = inlined_call_operand.vmem [shape: f32[16,128], index: 4, kind: output, shape index: {2}]   ;;  %s196_s6 = inlined_call_operand.vmem [shape: s32[16,128], index: 6, kind: output, shape index: {4}]   ;;  %s197_s7 = inlined_call_operand.vmem [shape: s32[16,128], index: 7, kind: output, shape index: {5}]   ;;  %s198_s8 = inlined_call_operand.vmem [shape: s32[16,128], index: 8, kind: output, shape index: {6}]   ;;  %s199_s5 = inlined_call_operand.vmem [shape: f32[16,128], index: 5, kind: output, shape index: {3}]  }
   0x1   :  { %v18_v0 = vld [vmem:[%s191_s0] sm:$0xff]  ;;  %v19_v2 = vld [vmem:[%s191_s0 + $0x8] sm:$0xff] }
   0x2   :  { %v20_v1 = vld [vmem:[%s192_s1] sm:$0xff]  ;;  %v21_v4 = vld [vmem:[%s192_s1 + $0x8] sm:$0xff] }
   0x3   :  { %v22_v3 = vadd.f32 %v20_v1, %v18_v0  ;;  %v26_v5 = vsub.f32 %v18_v0, %v20_v1  ;;  %v30_v6 = vmul.f32 %v20_v1, %v18_v0  ;;  %87 = vrcp.f32 %v20_v1 }
   0x4   :  { %v23_v7 = vadd.f32 %v21_v4, %v19_v2  ;;  %v27_v8 = vsub.f32 %v19_v2, %v21_v4  ;;  %v31_v9 = vmul.f32 %v21_v4, %v19_v2  ;;  %89 = vrcp.f32 %v21_v4 }
   0x5   :  { %24 = vst [vmem:[%s193_s2] sm:$0xff] %v22_v3  ;;  %28 = vst [vmem:[%s194_s3] sm:$0xff] %v26_v5  ;;  %vm40_vm0 = vcmp.gt.f32.partialorder %v18_v0, %v20_v1  ;;  %vm41_vm1 = vcmp.gt.f32.partialorder %v19_v2, %v21_v4  ;;  %vm46_vm2 = vcmp.lt.f32.partialorder %v18_v0, %v20_v1 }
   0x6   :  { %32 = vst [vmem:[%s195_s4] sm:$0xff] %v30_v6  ;;  %vm47_vm3 = vcmp.lt.f32.partialorder %v19_v2, %v21_v4  ;;  %25 = vst [vmem:[%s193_s2 + $0x8] sm:$0xff] %v23_v7  ;;  %v42_v11 = vsel %vm40_vm0, 1, %v91_v10  ;;  %v43_v12 = vsel %vm41_vm1, 1, %v91_v10  ;;  %v48_v13 = vsel %vm46_vm2, 1, %v91_v10 }
   0x7   :  { %29 = vst [vmem:[%s194_s3 + $0x8] sm:$0xff] %v27_v8  ;;  %33 = vst [vmem:[%s195_s4 + $0x8] sm:$0xff] %v31_v9  ;;  %v49_v14 = vsel %vm47_vm3, 1, %v91_v10  ;;  %vm52_vm4 = vcmp.eq.f32.partialorder %v18_v0, %v20_v1  ;;  %vm53_vm5 = vcmp.eq.f32.partialorder %v19_v2, %v21_v4 }
   0x8   :  { %44 = vst [vmem:[%s196_s6] sm:$0xff] %v42_v11  ;;  %45 = vst [vmem:[%s196_s6 + $0x8] sm:$0xff] %v43_v12  ;;  %v54_v15 = vsel %vm52_vm4, 1, %v91_v10  ;;  %v55_v16 = vsel %vm53_vm5, 1, %v91_v10 }
   0x9   :  { %50 = vst [vmem:[%s197_s7] sm:$0xff] %v48_v13  ;;  %51 = vst [vmem:[%s197_s7 + $0x8] sm:$0xff] %v49_v14 }
   0xa   :  { %56 = vst [vmem:[%s198_s8] sm:$0xff] %v54_v15  ;;  %57 = vst [vmem:[%s198_s8 + $0x8] sm:$0xff] %v55_v16 }
  0x10   :  { %v88_v17 = vpop.eup %87 }
  0x11   :  { %v90_v18 = vpop.eup %89  ;;  %v35_v19 = vmul.f32 %v88_v17, %v18_v0 }
  0x12   :  { %v37_v20 = vmul.f32 %v90_v18, %v19_v2 }
  0x13   :  { %38 = vst [vmem:[%s199_s5] sm:$0xff] %v35_v19 }
  0x14   :  { %39 = vst [vmem:[%s199_s5 + $0x8] sm:$0xff] %v37_v20 }

</bundles_post_ra>
